<compile_context>
chip_gen: v5e
topology: v5e:2x2
jax: 0.10.0
libtpu: 0.0.40
codegen_flags: <defaults>
</compile_context>

<pallas_src>
import functools

import jax
import jax.numpy as jnp
from jax.experimental import pallas as pl
from jax.experimental.pallas import tpu as pltpu


LANE = 128        # TPU lane width — pad all feature dims to this.
TM_MAX = 2048     # max batch-tile rows (comfortably within every chip's VMEM).


def _round_up(x: int, m: int) -> int:
    return ((x + m - 1) // m) * m


def _cdiv(a: int, b: int) -> int:
    return (a + b - 1) // b


def dqn_kernel(x_ref,
               w1_ref, b1_ref,
               w2_ref, b2_ref,
               w3_ref, b3_ref,
               w4_ref, b4_ref,
               o_ref):
    """Fused forward for one batch tile:
       relu(relu(relu(x@W1+b1)@W2+b2)@W3+b3)@W4+b4.

    x/weights are bf16 (MXU inputs); accumulation + bias + ReLU in f32;
    output stored as bf16 (lane-dense, padded to 128 columns).
    """
    x = x_ref[...]                                            # bf16 [TM, in_pad]

    h = jnp.dot(x, w1_ref[...], preferred_element_type=jnp.float32) + b1_ref[...]
    h = jnp.maximum(h, 0.0)

    h = jnp.dot(h.astype(jnp.bfloat16), w2_ref[...],
                preferred_element_type=jnp.float32) + b2_ref[...]
    h = jnp.maximum(h, 0.0)

    h = jnp.dot(h.astype(jnp.bfloat16), w3_ref[...],
                preferred_element_type=jnp.float32) + b3_ref[...]
    h = jnp.maximum(h, 0.0)

    h = jnp.dot(h.astype(jnp.bfloat16), w4_ref[...],
                preferred_element_type=jnp.float32) + b4_ref[...]

    o_ref[...] = h.astype(o_ref.dtype)                        # bf16 store


@functools.partial(jax.jit, static_argnames=("out_dim",))
def _dqn_apply(x, w1, b1, w2, b2, w3, b3, w4, b4, *, out_dim):
    B, in_dim = x.shape
    in_pad = w1.shape[0]
    out_pad = w4.shape[1]

    # ---- static batch-tile selection (all Python ints under jit) ----
    B16 = _round_up(max(B, 1), 16)
    if B16 <= 16:
        n_tiles, tm = 1, B16                       # tiny batch: one small tile
    else:
        # >= 2 grid steps so "parallel" can shard across v7x's two TCs,
        # tiles capped at TM_MAX to amortize per-step overhead for big B.
        n_tiles = max(2, _cdiv(B16, TM_MAX))
        tm = _round_up(_cdiv(B16, n_tiles), 16)
    B_pad = tm * n_tiles

    # Single fused pad + cast feeding the kernel (one XLA op, bf16 lane-dense).
    x_pad = jnp.pad(x.astype(jnp.bfloat16),
                    ((0, B_pad - B), (0, in_pad - in_dim)))

    const = lambda i: (0, 0)  # weights / biases resident across grid steps

    out = pl.pallas_call(
        dqn_kernel,
        out_shape=jax.ShapeDtypeStruct((B_pad, out_pad), jnp.bfloat16),
        grid=(n_tiles,),
        in_specs=[
            pl.BlockSpec((tm, in_pad), lambda i: (i, 0)),          # x tile (pipelined)
            pl.BlockSpec(w1.shape, const), pl.BlockSpec(b1.shape, const),
            pl.BlockSpec(w2.shape, const), pl.BlockSpec(b2.shape, const),
            pl.BlockSpec(w3.shape, const), pl.BlockSpec(b3.shape, const),
            pl.BlockSpec(w4.shape, const), pl.BlockSpec(b4.shape, const),
        ],
        out_specs=pl.BlockSpec((tm, out_pad), lambda i: (i, 0)),
        compiler_params=pltpu.CompilerParams(
            dimension_semantics=("parallel",),                     # megacore on v7x
        ),
    )(x_pad, w1, b1, w2, b2, w3, b3, w4, b4)

    # Single fused slice of the real rows/columns; up-cast of the tiny
    # [B, out_dim] result is negligible.
    return out[:B, :out_dim].astype(jnp.float32)


def dqn_forward(x, params):
    """x: [B, input_dim] float32.  Returns [B, output_dim] float32."""
    return _dqn_apply(x,
                      params["w1"], params["b1"],
                      params["w2"], params["b2"],
                      params["w3"], params["b3"],
                      params["w4"], params["b4"],
                      out_dim=params["out_dim"])


def init_dqn_params(key, input_dim, hidden_dim1, hidden_dim2, hidden_dim3,
                    output_dim):
    """Mimics nn.Linear's U(-1/sqrt(fan_in), 1/sqrt(fan_in)) init.

    Weights are stored as [in_pad, out_pad] (transposed vs PyTorch, zero-padded
    to 128-lane multiples) in bf16; biases as [1, out_pad] in f32.
    Zero padding is load-bearing: padded rows/cols contribute nothing to the
    real outputs.
    """
    dims = [input_dim, hidden_dim1, hidden_dim2, hidden_dim3, output_dim]
    pdims = [_round_up(d, LANE) for d in dims]

    params = {"out_dim": output_dim}
    keys = jax.random.split(key, 8)
    for i in range(4):
        fan_in, fan_out = dims[i], dims[i + 1]
        pin, pout = pdims[i], pdims[i + 1]
        bound = 1.0 / float(fan_in) ** 0.5
        w = jax.random.uniform(keys[2 * i], (fan_in, fan_out),
                               minval=-bound, maxval=bound, dtype=jnp.float32)
        b = jax.random.uniform(keys[2 * i + 1], (1, fan_out),
                               minval=-bound, maxval=bound, dtype=jnp.float32)
        w_pad = jnp.zeros((pin, pout), jnp.bfloat16).at[:fan_in, :fan_out].set(
            w.astype(jnp.bfloat16))
        b_pad = jnp.zeros((1, pout), jnp.float32).at[:, :fan_out].set(b)
        params[f"w{i + 1}"] = w_pad
        params[f"b{i + 1}"] = b_pad
    return params


def dqn_reference(x, params):
    """Plain-JAX reference with the same bf16-matmul / f32-accumulate recipe."""
    in_dim = x.shape[1]
    in_pad = params["w1"].shape[0]
    h = jnp.zeros((x.shape[0], in_pad), jnp.bfloat16).at[:, :in_dim].set(
        x.astype(jnp.bfloat16))
    for i in range(1, 4):
        h = jnp.dot(h, params[f"w{i}"],
                    preferred_element_type=jnp.float32) + params[f"b{i}"]
        h = jnp.maximum(h, 0.0).astype(jnp.bfloat16)
    out = jnp.dot(h, params["w4"],
                  preferred_element_type=jnp.float32) + params["b4"]
    out = out.astype(jnp.bfloat16)                     # match bf16 kernel output
    return out[:, :params["out_dim"]].astype(jnp.float32)


if __name__ == "__main__":
    # Small shapes consistent with the module signature.
    input_dim, hidden_dim1, hidden_dim2, hidden_dim3, output_dim = 16, 32, 32, 32, 8

    key = jax.random.PRNGKey(0)
    key_x, key_x2, key_p = jax.random.split(key, 3)

    params = init_dqn_params(key_p, input_dim, hidden_dim1, hidden_dim2,
                             hidden_dim3, output_dim)

    # --- tiny batch (single-tile path) ---
    batch = 2
    x = jax.random.normal(key_x, (batch, input_dim), dtype=jnp.float32)
    out = jax.block_until_ready(dqn_forward(x, params))
    ref = dqn_reference(x, params)
    assert out.shape == (batch, output_dim), out.shape
    assert jnp.allclose(out, ref, atol=2e-2, rtol=2e-2), (
        jnp.max(jnp.abs(out - ref)))

    # --- non-divisible batch (multi-tile / partial-pad path) ---
    batch2 = 100
    x2 = jax.random.normal(key_x2, (batch2, input_dim), dtype=jnp.float32)
    out2 = jax.block_until_ready(dqn_forward(x2, params))
    ref2 = dqn_reference(x2, params)
    assert out2.shape == (batch2, output_dim), out2.shape
    assert jnp.allclose(out2, ref2, atol=2e-2, rtol=2e-2), (
        jnp.max(jnp.abs(out2 - ref2)))

    print("KERNEL_OK")
</pallas_src>

<mosaic_0001>
module attributes {stable_mosaic.version = 11 : i64} {
  func.func @dqn_kernel(%arg0: i32, %arg1: memref<16x128xbf16, #tpu.memory_space<vmem>>, %arg2: memref<128x128xbf16, #tpu.memory_space<vmem>>, %arg3: memref<1x128xf32, #tpu.memory_space<vmem>>, %arg4: memref<128x128xbf16, #tpu.memory_space<vmem>>, %arg5: memref<1x128xf32, #tpu.memory_space<vmem>>, %arg6: memref<128x128xbf16, #tpu.memory_space<vmem>>, %arg7: memref<1x128xf32, #tpu.memory_space<vmem>>, %arg8: memref<128x128xbf16, #tpu.memory_space<vmem>>, %arg9: memref<1x128xf32, #tpu.memory_space<vmem>>, %arg10: memref<16x128xbf16, #tpu.memory_space<vmem>>) attributes {dimension_semantics = [#tpu.dimension_semantics<parallel>], iteration_bounds = array<i64: 1>, scalar_prefetch = 0 : i64, scratch_operands = 0 : i64, tpu.core_type = #tpu.core_type<tc>, window_params = [{transform_indices = @transform_0, window_bounds = array<i64: 16, 128>}, {pipeline_mode = #tpu.pipeline_mode<synchronous>, transform_indices = @transform_1, window_bounds = array<i64: 128, 128>}, {pipeline_mode = #tpu.pipeline_mode<synchronous>, transform_indices = @transform_2, window_bounds = array<i64: 1, 128>}, {pipeline_mode = #tpu.pipeline_mode<synchronous>, transform_indices = @transform_3, window_bounds = array<i64: 128, 128>}, {pipeline_mode = #tpu.pipeline_mode<synchronous>, transform_indices = @transform_4, window_bounds = array<i64: 1, 128>}, {pipeline_mode = #tpu.pipeline_mode<synchronous>, transform_indices = @transform_5, window_bounds = array<i64: 128, 128>}, {pipeline_mode = #tpu.pipeline_mode<synchronous>, transform_indices = @transform_6, window_bounds = array<i64: 1, 128>}, {pipeline_mode = #tpu.pipeline_mode<synchronous>, transform_indices = @transform_7, window_bounds = array<i64: 128, 128>}, {pipeline_mode = #tpu.pipeline_mode<synchronous>, transform_indices = @transform_8, window_bounds = array<i64: 1, 128>}, {transform_indices = @transform_9, window_bounds = array<i64: 16, 128>}]} {
    %c0 = arith.constant 0 : index
    %c0_0 = arith.constant 0 : index
    %0 = vector.load %arg1[%c0, %c0_0] : memref<16x128xbf16, #tpu.memory_space<vmem>>, vector<16x128xbf16>
    %c0_1 = arith.constant 0 : index
    %c0_2 = arith.constant 0 : index
    %1 = vector.load %arg2[%c0_1, %c0_2] : memref<128x128xbf16, #tpu.memory_space<vmem>>, vector<128x128xbf16>
    %cst = arith.constant dense<0.000000e+00> : vector<16x128xf32>
    %2 = tpu.matmul %0, %1, %cst {dimension_numbers = #tpu.dot_dimension_numbers<[1], [0], [0], [1], [0, 0, 1, 1], [], []>} : vector<16x128xbf16>, vector<128x128xbf16>, vector<16x128xf32> -> vector<16x128xf32>
    %c0_3 = arith.constant 0 : index
    %c0_4 = arith.constant 0 : index
    %3 = vector.load %arg3[%c0_3, %c0_4] : memref<1x128xf32, #tpu.memory_space<vmem>>, vector<1x128xf32>
    %4 = vector.broadcast %3 : vector<1x128xf32> to vector<16x128xf32>
    %5 = arith.addf %2, %4 : vector<16x128xf32>
    %cst_5 = arith.constant 0.000000e+00 : f32
    %6 = vector.broadcast %cst_5 : f32 to vector<16x128xf32>
    %7 = arith.maximumf %5, %6 : vector<16x128xf32>
    %8 = arith.truncf %7 : vector<16x128xf32> to vector<16x128xbf16>
    %c0_6 = arith.constant 0 : index
    %c0_7 = arith.constant 0 : index
    %9 = vector.load %arg4[%c0_6, %c0_7] : memref<128x128xbf16, #tpu.memory_space<vmem>>, vector<128x128xbf16>
    %cst_8 = arith.constant dense<0.000000e+00> : vector<16x128xf32>
    %10 = tpu.matmul %8, %9, %cst_8 {dimension_numbers = #tpu.dot_dimension_numbers<[1], [0], [0], [1], [0, 0, 1, 1], [], []>} : vector<16x128xbf16>, vector<128x128xbf16>, vector<16x128xf32> -> vector<16x128xf32>
    %c0_9 = arith.constant 0 : index
    %c0_10 = arith.constant 0 : index
    %11 = vector.load %arg5[%c0_9, %c0_10] : memref<1x128xf32, #tpu.memory_space<vmem>>, vector<1x128xf32>
    %12 = vector.broadcast %11 : vector<1x128xf32> to vector<16x128xf32>
    %13 = arith.addf %10, %12 : vector<16x128xf32>
    %cst_11 = arith.constant 0.000000e+00 : f32
    %14 = vector.broadcast %cst_11 : f32 to vector<16x128xf32>
    %15 = arith.maximumf %13, %14 : vector<16x128xf32>
    %16 = arith.truncf %15 : vector<16x128xf32> to vector<16x128xbf16>
    %c0_12 = arith.constant 0 : index
    %c0_13 = arith.constant 0 : index
    %17 = vector.load %arg6[%c0_12, %c0_13] : memref<128x128xbf16, #tpu.memory_space<vmem>>, vector<128x128xbf16>
    %cst_14 = arith.constant dense<0.000000e+00> : vector<16x128xf32>
    %18 = tpu.matmul %16, %17, %cst_14 {dimension_numbers = #tpu.dot_dimension_numbers<[1], [0], [0], [1], [0, 0, 1, 1], [], []>} : vector<16x128xbf16>, vector<128x128xbf16>, vector<16x128xf32> -> vector<16x128xf32>
    %c0_15 = arith.constant 0 : index
    %c0_16 = arith.constant 0 : index
    %19 = vector.load %arg7[%c0_15, %c0_16] : memref<1x128xf32, #tpu.memory_space<vmem>>, vector<1x128xf32>
    %20 = vector.broadcast %19 : vector<1x128xf32> to vector<16x128xf32>
    %21 = arith.addf %18, %20 : vector<16x128xf32>
    %cst_17 = arith.constant 0.000000e+00 : f32
    %22 = vector.broadcast %cst_17 : f32 to vector<16x128xf32>
    %23 = arith.maximumf %21, %22 : vector<16x128xf32>
    %24 = arith.truncf %23 : vector<16x128xf32> to vector<16x128xbf16>
    %c0_18 = arith.constant 0 : index
    %c0_19 = arith.constant 0 : index
    %25 = vector.load %arg8[%c0_18, %c0_19] : memref<128x128xbf16, #tpu.memory_space<vmem>>, vector<128x128xbf16>
    %cst_20 = arith.constant dense<0.000000e+00> : vector<16x128xf32>
    %26 = tpu.matmul %24, %25, %cst_20 {dimension_numbers = #tpu.dot_dimension_numbers<[1], [0], [0], [1], [0, 0, 1, 1], [], []>} : vector<16x128xbf16>, vector<128x128xbf16>, vector<16x128xf32> -> vector<16x128xf32>
    %c0_21 = arith.constant 0 : index
    %c0_22 = arith.constant 0 : index
    %27 = vector.load %arg9[%c0_21, %c0_22] : memref<1x128xf32, #tpu.memory_space<vmem>>, vector<1x128xf32>
    %28 = vector.broadcast %27 : vector<1x128xf32> to vector<16x128xf32>
    %29 = arith.addf %26, %28 : vector<16x128xf32>
    %30 = arith.truncf %29 : vector<16x128xf32> to vector<16x128xbf16>
    %c0_23 = arith.constant 0 : index
    %c0_24 = arith.constant 0 : index
    %31 = vector.load %arg10[%c0_23, %c0_24] : memref<16x128xbf16, #tpu.memory_space<vmem>>, vector<16x128xbf16>
    tpu.vector_store %arg10[%c0_23, %c0_24], %30 {strides = array<i32>} : memref<16x128xbf16, #tpu.memory_space<vmem>>, vector<16x128xbf16>,
    return
  }
  func.func @transform_0(%arg0: i32) -> (i32, i32) {
    %c0_i32 = arith.constant 0 : i32
    %c0_i32_0 = arith.constant 0 : i32
    return %arg0, %c0_i32 : i32, i32
  }
  func.func @transform_1(%arg0: i32) -> (i32, i32) {
    %c0_i32 = arith.constant 0 : i32
    %c0_i32_0 = arith.constant 0 : i32
    %c0_i32_1 = arith.constant 0 : i32
    return %c0_i32, %c0_i32_0 : i32, i32
  }
  func.func @transform_2(%arg0: i32) -> (i32, i32) {
    %c0_i32 = arith.constant 0 : i32
    %c0_i32_0 = arith.constant 0 : i32
    %c0_i32_1 = arith.constant 0 : i32
    return %c0_i32, %c0_i32_0 : i32, i32
  }
  func.func @transform_3(%arg0: i32) -> (i32, i32) {
    %c0_i32 = arith.constant 0 : i32
    %c0_i32_0 = arith.constant 0 : i32
    %c0_i32_1 = arith.constant 0 : i32
    return %c0_i32, %c0_i32_0 : i32, i32
  }
  func.func @transform_4(%arg0: i32) -> (i32, i32) {
    %c0_i32 = arith.constant 0 : i32
    %c0_i32_0 = arith.constant 0 : i32
    %c0_i32_1 = arith.constant 0 : i32
    return %c0_i32, %c0_i32_0 : i32, i32
  }
  func.func @transform_5(%arg0: i32) -> (i32, i32) {
    %c0_i32 = arith.constant 0 : i32
    %c0_i32_0 = arith.constant 0 : i32
    %c0_i32_1 = arith.constant 0 : i32
    return %c0_i32, %c0_i32_0 : i32, i32
  }
  func.func @transform_6(%arg0: i32) -> (i32, i32) {
    %c0_i32 = arith.constant 0 : i32
    %c0_i32_0 = arith.constant 0 : i32
    %c0_i32_1 = arith.constant 0 : i32
    return %c0_i32, %c0_i32_0 : i32, i32
  }
  func.func @transform_7(%arg0: i32) -> (i32, i32) {
    %c0_i32 = arith.constant 0 : i32
    %c0_i32_0 = arith.constant 0 : i32
    %c0_i32_1 = arith.constant 0 : i32
    return %c0_i32, %c0_i32_0 : i32, i32
  }
  func.func @transform_8(%arg0: i32) -> (i32, i32) {
    %c0_i32 = arith.constant 0 : i32
    %c0_i32_0 = arith.constant 0 : i32
    %c0_i32_1 = arith.constant 0 : i32
    return %c0_i32, %c0_i32_0 : i32, i32
  }
  func.func @transform_9(%arg0: i32) -> (i32, i32) {
    %c0_i32 = arith.constant 0 : i32
    %c0_i32_0 = arith.constant 0 : i32
    return %arg0, %c0_i32 : i32, i32
  }
}

</mosaic_0001>

<bundles_post_ra>
// kernel: _dqn_apply.1
= control target key start
LH: loop header
LB: loop body
LE: loop exit
PB: predicated region body
PF: predicated region fallthrough
CT: control target
= control target key end

     0   :  { %14 = vsyncpa [#allocation3], 0  ;;  %s819_s0 = inlined_call_operand.vmem [shape: bf16[16,128], index: 0, kind: input, shape index: {}]   ;;  %s820_s1 = inlined_call_operand.hbm [shape: bf16[128,128], index: 1, kind: input, shape index: {}]   ;;  %s821_s2 = inlined_call_operand.vmem [shape: f32[1,128], index: 2, kind: input, shape index: {}]   ;;  %s822_s3 = inlined_call_operand.hbm [shape: bf16[128,128], index: 3, kind: input, shape index: {}]   ;;  %s823_s4 = inlined_call_operand.vmem [shape: f32[1,128], index: 4, kind: input, shape index: {}]   ;;  %s824_s5 = inlined_call_operand.hbm [shape: bf16[128,128], index: 5, kind: input, shape index: {}]   ;;  %s825_s6 = inlined_call_operand.vmem [shape: f32[1,128], index: 6, kind: input, shape index: {}]   ;;  %s826_s7 = inlined_call_operand.hbm [shape: bf16[128,128], index: 7, kind: input, shape index: {}]   ;;  %s827_s8 = inlined_call_operand.vmem [shape: f32[1,128], index: 8, kind: input, shape index: {}]   ;;  %s828_s9 = inlined_call_operand.vmem [shape: bf16[16,128], index: 9, kind: output, shape index: {}]  }
   0x1   :  { %15 = vsyncpa [#allocation5], 0 }
   0x2   :  { %16 = vsyncpa [#allocation8], 0  ;;  %s38_s11 = sshll.u32 %s822_s3, 4  ;;  %s733_s12 = smov [#allocation4]   ;;  %s39_s11 = int_to_ptr.hbm [resolvable:$true] %s38_s11 }
   0x3   :  { %s40_s13 = sshll.u32 %s733_s12, 4  ;;  %s23_s16 = sshll.u32 %s820_s1, 4  ;;  %s41_s13 = int_to_ptr.vmem [resolvable:$true] %s40_s13  ;;  %s24_s16 = int_to_ptr.hbm [resolvable:$true] %s23_s16 }
   0x4   :  { %s734_s17 = smov 64   ;;  %s735_s18 = smov 4  }
   0x5   :  { %46 = dma.hbm_to_vmem [thread:$0]  %s39_s11, 1024, %s41_s13, [#allocation5], %s734_s17, %s734_s17, %s735_s18  }
   0x6   :  { %s736_s19 = smov [#allocation2]   ;;  %s53_s23 = sshll.u32 %s824_s5, 4  ;;  %s54_s23 = int_to_ptr.hbm [resolvable:$true] %s53_s23 }
   0x7   :  { %s25_s20 = sshll.u32 %s736_s19, 4  ;;  %s68_s25 = sshll.u32 %s826_s7, 4  ;;  %s26_s20 = int_to_ptr.vmem [resolvable:$true] %s25_s20  ;;  %s69_s25 = int_to_ptr.hbm [resolvable:$true] %s68_s25 }
   0x8   :  { %31 = dma.hbm_to_vmem [thread:$0]  %s24_s16, 1024, %s26_s20, [#allocation3], %s734_s17, %s734_s17, %s735_s18  }
   0x9   :  { %s737_s26 = smov [#allocation6]   ;;  %s738_s1 = smov [#allocation7]  }
   0xa   :  { %s55_s27 = sshll.u32 %s737_s26, 4  ;;  %s70_s28 = sshll.u32 %s738_s1, 4  ;;  %s56_s27 = int_to_ptr.vmem [resolvable:$true] %s55_s27  ;;  %s71_s28 = int_to_ptr.vmem [resolvable:$true] %s70_s28 }
   0xb   :  { %61 = dma.hbm_to_vmem [thread:$0]  %s54_s23, 1024, %s56_s27, [#allocation5], %s734_s17, %s734_s17, %s735_s18  }
   0xc   :  { %76 = dma.hbm_to_vmem [thread:$0]  %s69_s25, 1024, %s71_s28, [#allocation8], %s734_s17, %s734_s17, %s735_s18  }
   0xd   :  { %727 = dma.done.wait [#allocation3], 1024  }
   0xe   :  { %728 = vsyncadd [#allocation3], 4294966272 }
   0xf   :  { %729 = dma.done.wait [#allocation5], 2048  }
  0x10   :  { %730 = vsyncadd [#allocation5], 4294965248 }
  0x11   :  { %731 = dma.done.wait [#allocation8], 1024  }
  0x12   :  { %732 = vsyncadd [#allocation8], 4294966272  ;;  %v591_v0 = vld [vmem:[#allocation2 + $0x38] sm:$0xff]  ;;  %v590_v1 = vld [vmem:[#allocation2 + $0x30] sm:$0xff] }
  0x13   :  { %171 = vmatpush.bf16.msra.mxu0 %v591_v0  ;;  %v599_v2 = vld [vmem:[#allocation4 + $0x38] sm:$0xff]  ;;  %v598_v3 = vld [vmem:[#allocation4 + $0x30] sm:$0xff]  ;;  %v589_v4 = vld [vmem:[#allocation2 + $0x28] sm:$0xff] }
  0x14   :  { %256 = vmatpush.bf16.msra.mxu1 %v599_v2  ;;  %v597_v5 = vld [vmem:[#allocation4 + $0x28] sm:$0xff]  ;;  %v588_v6 = vld [vmem:[#allocation2 + $0x20] sm:$0xff]  ;;  %v587_v8 = vld [vmem:[#allocation2 + $0x18] sm:$0xff] }
  0x15   :  { %v596_v7 = vld [vmem:[#allocation4 + $0x20] sm:$0xff]  ;;  %v586_v9 = vld [vmem:[#allocation2 + $0x10] sm:$0xff]  ;;  %v585_v10 = vld [vmem:[#allocation2 + $0x8] sm:$0xff] }
  0x16   :  { %v584_v11 = vld [vmem:[#allocation2] sm:$0xff]  ;;  %v595_v13 = vld [vmem:[#allocation4 + $0x18] sm:$0xff]  ;;  %v594_v14 = vld [vmem:[#allocation4 + $0x10] sm:$0xff] }
  0x17   :  { %172 = vmatpush.bf16.msra.mxu0 %v590_v1  ;;  %v583_v12 = vld [vmem:[%s819_s0] sm:$0xff]  ;;  %v593_v15 = vld [vmem:[#allocation4 + $0x8] sm:$0xff]  ;;  %v607_v17 = vld [vmem:[#allocation6 + $0x38] sm:$0xff] }
  0x18   :  { %257 = vmatpush.bf16.msra.mxu1 %v598_v3  ;;  %v592_v16 = vld [vmem:[#allocation4] sm:$0xff]  ;;  %341 = vmatpush.bf16.msra.mxu2 %v607_v17  ;;  %v606_v18 = vld [vmem:[#allocation6 + $0x30] sm:$0xff]  ;;  %v605_v19 = vld [vmem:[#allocation6 + $0x28] sm:$0xff] }
  0x19   :  { %v604_v20 = vld [vmem:[#allocation6 + $0x20] sm:$0xff]  ;;  %v603_v29 = vld [vmem:[#allocation6 + $0x18] sm:$0xff]  ;;  %v602_v30 = vld [vmem:[#allocation6 + $0x10] sm:$0xff] }
  0x1a   :  { %v627_v22 = vld [vmem:[%s821_s2] ss:$0 sm:$0xff]  ;;  %v601_v31 = vld [vmem:[#allocation6 + $0x8] sm:$0xff]  ;;  %v615_v33 = vld [vmem:[#allocation7 + $0x38] sm:$0xff] }
  0x1b   :  { %173 = vmatpush.bf16.msra.mxu0 %v589_v4  ;;  %v600_v32 = vld [vmem:[#allocation6] sm:$0xff]  ;;  %426 = vmatpush.bf16.msra.mxu3 %v615_v33  ;;  %v614_v34 = vld [vmem:[#allocation7 + $0x30] sm:$0xff]  ;;  %v613_v35 = vld [vmem:[#allocation7 + $0x28] sm:$0xff] }
  0x1c   :  { %258 = vmatpush.bf16.msra.mxu1 %v597_v5  ;;  %342 = vmatpush.bf16.msra.mxu2 %v606_v18  ;;  %v612_v36 = vld [vmem:[#allocation7 + $0x20] sm:$0xff]  ;;  %v611_v45 = vld [vmem:[#allocation7 + $0x18] sm:$0xff]  ;;  %v610_v46 = vld [vmem:[#allocation7 + $0x10] sm:$0xff] }
  0x1d   :  { %v628_v38 = vld [vmem:[%s823_s4] ss:$0 sm:$0xff]  ;;  %v609_v47 = vld [vmem:[#allocation7 + $0x8] sm:$0xff] }
  0x1e   :  { %v608_v48 = vld [vmem:[#allocation7] sm:$0xff] }
  0x1f   :  { %174 = vmatpush.bf16.msra.mxu0 %v588_v6  ;;  %427 = vmatpush.bf16.msra.mxu3 %v614_v34  ;;  %v629_v50 = vld [vmem:[%s825_s6] ss:$0 sm:$0xff] }
  0x20   :  { %259 = vmatpush.bf16.msra.mxu1 %v596_v7  ;;  %343 = vmatpush.bf16.msra.mxu2 %v605_v19  ;;  %v630_v58 = vld [vmem:[%s827_s8] ss:$0 sm:$0xff] }
  0x23   :  { %175 = vmatpush.bf16.msra.mxu0 %v587_v8  ;;  %428 = vmatpush.bf16.msra.mxu3 %v613_v35 }
  0x24   :  { %260 = vmatpush.bf16.msra.mxu1 %v595_v13  ;;  %344 = vmatpush.bf16.msra.mxu2 %v604_v20 }
  0x27   :  { %176 = vmatpush.bf16.msra.mxu0 %v586_v9  ;;  %429 = vmatpush.bf16.msra.mxu3 %v612_v36 }
  0x28   :  { %261 = vmatpush.bf16.msra.mxu1 %v594_v14  ;;  %345 = vmatpush.bf16.msra.mxu2 %v603_v29 }
  0x2b   :  { %177 = vmatpush.bf16.msra.mxu0 %v585_v10  ;;  %430 = vmatpush.bf16.msra.mxu3 %v611_v45 }
  0x2c   :  { %262 = vmatpush.bf16.msra.mxu1 %v593_v15  ;;  %346 = vmatpush.bf16.msra.mxu2 %v602_v30 }
  0x2f   :  { %178 = vmatpush.bf16.msra.mxu0 %v584_v11  ;;  %431 = vmatpush.bf16.msra.mxu3 %v610_v46 }
  0x30   :  { %263 = vmatpush.bf16.msra.mxu1 %v592_v16  ;;  %347 = vmatpush.bf16.msra.mxu2 %v601_v31 }
  0x32   :  { %179 = vmatmul.bf16.vlgmr.msra.gmra.mxu0 %v583_v12 }
  0x33   :  { %432 = vmatpush.bf16.msra.mxu3 %v609_v47 }
  0x34   :  { %348 = vmatpush.bf16.msra.mxu2 %v600_v32 }
  0x37   :  { %433 = vmatpush.bf16.msra.mxu3 %v608_v48 }
  0xaf   :  { %v180_v21 = vpop.f32.mrf.mxu0 }
  0xb0   :  { %v181_v23 = vadd.f32 %v627_v22, %v180_v21 }
  0xb2   :  { %v185_v26 = vmax.f32 %v181_v23, 0.0 }
  0xb7   :  { %v182_v24 = vpop.f32.mrf.mxu0 }
  0xb8   :  { %v183_v25 = vadd.f32 %v627_v22, %v182_v24 }
  0xba   :  { %v186_v27 = vmax.f32 %v183_v25, 0.0 }
  0xbc   :  { %v187_v28 = vpack.c.bf16 %v186_v27, %v185_v26 }
  0xbe   :  { %264 = vmatmul.bf16.vlgmr.msra.gmra.mxu1 %v187_v28 }
 0x13b   :  { %v265_v37 = vpop.f32.mrf.mxu1 }
 0x13c   :  { %v266_v39 = vadd.f32 %v628_v38, %v265_v37 }
 0x13e   :  { %v270_v42 = vmax.f32 %v266_v39, 0.0 }
 0x143   :  { %v267_v40 = vpop.f32.mrf.mxu1 }
 0x144   :  { %v268_v41 = vadd.f32 %v628_v38, %v267_v40 }
 0x146   :  { %v271_v43 = vmax.f32 %v268_v41, 0.0 }
 0x148   :  { %v272_v44 = vpack.c.bf16 %v271_v43, %v270_v42 }
 0x14a   :  { %349 = vmatmul.bf16.vlgmr.msra.gmra.mxu2 %v272_v44 }
 0x1cd   :  { %v350_v49 = vpop.f32.mrf.mxu2 }
 0x1ce   :  { %v351_v51 = vadd.f32 %v629_v50, %v350_v49 }
 0x1d0   :  { %v355_v54 = vmax.f32 %v351_v51, 0.0 }
 0x1d5   :  { %v352_v52 = vpop.f32.mrf.mxu2 }
 0x1d6   :  { %v353_v53 = vadd.f32 %v629_v50, %v352_v52 }
 0x1d8   :  { %v356_v55 = vmax.f32 %v353_v53, 0.0 }
 0x1da   :  { %v357_v56 = vpack.c.bf16 %v356_v55, %v355_v54 }
 0x1dc   :  { %434 = vmatmul.bf16.vlgmr.msra.gmra.mxu3 %v357_v56 }
 0x25f   :  { %v435_v57 = vpop.f32.mrf.mxu3 }
 0x260   :  { %v436_v60 = vadd.f32 %v630_v58, %v435_v57 }
 0x267   :  { %v437_v59 = vpop.f32.mrf.mxu3 }
 0x268   :  { %v438_v61 = vadd.f32 %v630_v58, %v437_v59 }
 0x26a   :  { %v619_v62 = vpack.c.bf16 %v438_v61, %v436_v60 }
 0x26c   :  { %620 = vst [vmem:[%s828_s9] sm:$0xff] %v619_v62  }
 0x26d   :  { %448 = vsyncpa [#allocation3], 1 }
 0x26e   :  { %449 = vsyncpa [#allocation5], 1 }
 0x26f   :  { %450 = vsyncpa [#allocation8], 1 }

</bundles_post_ra>
